<compile_context>
chip_gen: v7x
topology: tpu7x:2x2x1
jax: 0.10.0
libtpu: 0.0.40
codegen_flags: <defaults>
</compile_context>

<pallas_src>
import functools

import jax
import jax.numpy as jnp
from jax.experimental import pallas as pl
from jax.experimental.pallas import tpu as pltpu


def _round_up(n, m):
    return ((n + m - 1) // m) * m


def _autoencoder_kernel(x_ref,
                        w1_ref, b1_ref,
                        w23_ref, b23_ref,
                        w4_ref, b4_ref,
                        out_ref):
    """Fused autoencoder forward on one batch tile.

    h1    = relu(x @ w1 + b1)              (enc0 + ReLU)
    h2    = relu(h1 @ w23 + b23)           (enc2 and dec0 folded together + ReLU)
    recon = h2 @ w4 + b4                   (dec2)

    MXU operands are bf16, accumulation and the elementwise epilogue are f32,
    output is stored in out_ref.dtype (bf16 by default).
    """
    x = x_ref[...].astype(jnp.bfloat16)                          # [bt, d_in]

    h1 = jnp.dot(x, w1_ref[...], preferred_element_type=jnp.float32)
    h1 = jnp.maximum(h1 + b1_ref[...], 0.0)                      # f32 [bt, 128]

    h2 = jnp.dot(h1.astype(jnp.bfloat16), w23_ref[...],
                 preferred_element_type=jnp.float32)
    h2 = jnp.maximum(h2 + b23_ref[...], 0.0)                     # f32 [bt, 128]

    recon = jnp.dot(h2.astype(jnp.bfloat16), w4_ref[...],
                    preferred_element_type=jnp.float32) + b4_ref[...]
    out_ref[...] = recon.astype(out_ref.dtype)                   # [bt, d_in]


def prepare_params(params, compute_dtype=jnp.bfloat16):
    """One-time glue (call once at parameter-load time, NOT per forward).

    Transposes PyTorch-layout [out, in] weights to [in, out], folds the two
    middle linears (enc2, dec0 -- no nonlinearity between them) into a single
    [128, 128] weight + bias in f32, then casts weights to the MXU compute
    dtype and biases to f32 row vectors. No feature padding is needed: every
    weight/bias block is the full array and d_in sits on the lane dim as the
    full array extent.
    """
    w1, b1 = params["enc0"]   # [128, d_in], [128]
    w2, b2 = params["enc2"]   # [latent, 128], [latent]
    w3, b3 = params["dec0"]   # [128, latent], [128]
    w4, b4 = params["dec2"]   # [d_in, 128], [d_in]

    w1t = w1.T.astype(compute_dtype)                        # [d_in, 128]
    b1r = b1.reshape(1, -1).astype(jnp.float32)             # [1, 128]

    # (h1 @ W2^T + b2) @ W3^T + b3 == h1 @ (W2^T @ W3^T) + (b2 @ W3^T + b3)
    w2t_f32 = w2.T.astype(jnp.float32)                      # [128, latent]
    w3t_f32 = w3.T.astype(jnp.float32)                      # [latent, 128]
    w23t = (w2t_f32 @ w3t_f32).astype(compute_dtype)        # [128, 128]
    b23r = (b2.astype(jnp.float32) @ w3t_f32
            + b3.astype(jnp.float32)).reshape(1, -1)        # [1, 128] f32

    w4t = w4.T.astype(compute_dtype)                        # [128, d_in]
    b4r = b4.reshape(1, -1).astype(jnp.float32)             # [1, d_in]
    return (w1t, b1r, w23t, b23r, w4t, b4r)


@functools.partial(jax.jit, static_argnames=("block_b", "out_dtype"))
def autoencoder_forward(x, prepared, block_b=1024, out_dtype=jnp.bfloat16):
    """x: [B, input_dim] float32. prepared: output of prepare_params().

    block_b: max batch tile (multiple of 16). 1024 amortizes the ~0.35 us
    per-grid-step overhead on all generations (v5e/v6e/v7x); per-tile VMEM is
    < 2 MiB so no vmem_limit_bytes override is needed even against v7x's 64 MiB
    VMEM / 32 MiB scoped default. For B >= 1024 the tile is capped at
    ceil(B/2) so the grid keeps >= 2 steps and the 'parallel' batch axis can
    shard across v7x's two TensorCores.

    Returns reconstruction [B, input_dim] in out_dtype (bf16 by default to
    halve output HBM traffic; pass out_dtype=jnp.float32 for an f32 result).
    """
    B, d_in = x.shape
    w1t, b1r, w23t, b23r, w4t, b4r = prepared

    bt = min(block_b, _round_up(B, 16))           # batch tile, multiple of 16
    if B >= 1024:
        # keep >= 2 grid steps for v7x dual-TC sharding of the parallel axis
        bt = min(bt, _round_up((B + 1) // 2, 16))
    b_pad = _round_up(B, bt)
    grid = (b_pad // bt,)

    # Pad the batch dim only when it does not divide the tile (narrow f32
    # array; no lane padding, no wrapper-side dtype cast).
    xp = x if b_pad == B else jnp.pad(x, ((0, b_pad - B), (0, 0)))

    def full(arr):
        # whole-array block, constant block index for every batch tile
        return pl.BlockSpec(arr.shape, lambda i: (0, 0))

    out = pl.pallas_call(
        _autoencoder_kernel,
        out_shape=jax.ShapeDtypeStruct((b_pad, d_in), out_dtype),
        grid_spec=pltpu.PrefetchScalarGridSpec(
            num_scalar_prefetch=0,
            grid=grid,
            in_specs=[
                pl.BlockSpec((bt, d_in), lambda i: (i, 0)),   # x tile (f32)
                full(w1t), full(b1r),
                full(w23t), full(b23r),
                full(w4t), full(b4r),
            ],
            out_specs=pl.BlockSpec((bt, d_in), lambda i: (i, 0)),
        ),
        compiler_params=pltpu.CompilerParams(
            dimension_semantics=("parallel",)),
    )(xp, w1t, b1r, w23t, b23r, w4t, b4r)

    return out if b_pad == B else out[:B]


def init_params(key, input_dim, latent_dim=20, hidden=128):
    """Deterministic PyTorch-style init: U(-1/sqrt(fan_in), 1/sqrt(fan_in))."""
    def linear(k, fan_in, fan_out):
        kw, kb = jax.random.split(k)
        bound = 1.0 / jnp.sqrt(fan_in)
        w = jax.random.uniform(kw, (fan_out, fan_in), jnp.float32, -bound, bound)
        b = jax.random.uniform(kb, (fan_out,), jnp.float32, -bound, bound)
        return w, b

    k1, k2, k3, k4 = jax.random.split(key, 4)
    return {
        "enc0": linear(k1, input_dim, hidden),
        "enc2": linear(k2, hidden, latent_dim),
        "dec0": linear(k3, latent_dim, hidden),
        "dec2": linear(k4, hidden, input_dim),
    }


def reference_forward(x, params):
    """Plain-JAX f32 reference identical to the PyTorch forward."""
    def lin(v, wb):
        w, b = wb
        return v @ w.T + b
    h = jnp.maximum(lin(x, params["enc0"]), 0.0)
    latent = lin(h, params["enc2"])
    h = jnp.maximum(lin(latent, params["dec0"]), 0.0)
    return lin(h, params["dec2"])


if __name__ == "__main__":
    key = jax.random.PRNGKey(0)
    kx, kp, kx2, kx3 = jax.random.split(key, 4)

    B, INPUT_DIM, LATENT = 8, 32, 20
    params = init_params(kp, INPUT_DIM, latent_dim=LATENT)
    prepared = prepare_params(params)            # one-time transpose/fuse/cast

    # Small batch (single grid step, batch padded 8 -> 16).
    x = jax.random.normal(kx, (B, INPUT_DIM), jnp.float32)
    out = jax.block_until_ready(autoencoder_forward(x, prepared))
    ref = reference_forward(x, params)
    assert out.shape == (B, INPUT_DIM)
    # bf16 MXU operands / bf16 output with f32 accumulation -> loose tolerance.
    assert jnp.allclose(out.astype(jnp.float32), ref, atol=3e-2, rtol=3e-2), \
        "mismatch (small batch)"

    # Batch not divisible by the tile: exercises padding + multi-step grid.
    B2 = 200
    x2 = jax.random.normal(kx2, (B2, INPUT_DIM), jnp.float32)
    out2 = jax.block_until_ready(autoencoder_forward(x2, prepared, block_b=64))
    ref2 = reference_forward(x2, params)
    assert out2.shape == (B2, INPUT_DIM)
    assert jnp.allclose(out2.astype(jnp.float32), ref2, atol=3e-2, rtol=3e-2), \
        "mismatch (padded batch)"

    # Larger batch: exercises the B >= 1024 path (tile capped so the parallel
    # grid axis keeps >= 2 steps for v7x dual-TC sharding).
    B3 = 1100
    x3 = jax.random.normal(kx3, (B3, INPUT_DIM), jnp.float32)
    out3 = jax.block_until_ready(autoencoder_forward(x3, prepared))
    ref3 = reference_forward(x3, params)
    assert out3.shape == (B3, INPUT_DIM)
    assert jnp.allclose(out3.astype(jnp.float32), ref3, atol=3e-2, rtol=3e-2), \
        "mismatch (large batch)"

    print("KERNEL_OK")
</pallas_src>

<mosaic_0001>
module attributes {stable_mosaic.version = 11 : i64} {
  func.func @_autoencoder_kernel(%arg0: i32, %arg1: memref<16x32xf32, #tpu.memory_space<vmem>>, %arg2: memref<32x128xbf16, #tpu.memory_space<vmem>>, %arg3: memref<1x128xf32, #tpu.memory_space<vmem>>, %arg4: memref<128x128xbf16, #tpu.memory_space<vmem>>, %arg5: memref<1x128xf32, #tpu.memory_space<vmem>>, %arg6: memref<128x32xbf16, #tpu.memory_space<vmem>>, %arg7: memref<1x32xf32, #tpu.memory_space<vmem>>, %arg8: memref<16x32xbf16, #tpu.memory_space<vmem>>) attributes {dimension_semantics = [#tpu.dimension_semantics<parallel>], iteration_bounds = array<i64: 1>, scalar_prefetch = 0 : i64, scratch_operands = 0 : i64, tpu.core_type = #tpu.core_type<tc>, window_params = [{transform_indices = @transform_0, window_bounds = array<i64: 16, 32>}, {pipeline_mode = #tpu.pipeline_mode<synchronous>, transform_indices = @transform_1, window_bounds = array<i64: 32, 128>}, {pipeline_mode = #tpu.pipeline_mode<synchronous>, transform_indices = @transform_2, window_bounds = array<i64: 1, 128>}, {pipeline_mode = #tpu.pipeline_mode<synchronous>, transform_indices = @transform_3, window_bounds = array<i64: 128, 128>}, {pipeline_mode = #tpu.pipeline_mode<synchronous>, transform_indices = @transform_4, window_bounds = array<i64: 1, 128>}, {pipeline_mode = #tpu.pipeline_mode<synchronous>, transform_indices = @transform_5, window_bounds = array<i64: 128, 32>}, {pipeline_mode = #tpu.pipeline_mode<synchronous>, transform_indices = @transform_6, window_bounds = array<i64: 1, 32>}, {transform_indices = @transform_7, window_bounds = array<i64: 16, 32>}]} {
    %c0 = arith.constant 0 : index
    %c0_0 = arith.constant 0 : index
    %0 = vector.load %arg1[%c0, %c0_0] : memref<16x32xf32, #tpu.memory_space<vmem>>, vector<16x32xf32>
    %1 = arith.truncf %0 : vector<16x32xf32> to vector<16x32xbf16>
    %c0_1 = arith.constant 0 : index
    %c0_2 = arith.constant 0 : index
    %2 = vector.load %arg2[%c0_1, %c0_2] : memref<32x128xbf16, #tpu.memory_space<vmem>>, vector<32x128xbf16>
    %cst = arith.constant dense<0.000000e+00> : vector<16x128xf32>
    %3 = tpu.matmul %1, %2, %cst {dimension_numbers = #tpu.dot_dimension_numbers<[1], [0], [0], [1], [0, 0, 1, 1], [], []>} : vector<16x32xbf16>, vector<32x128xbf16>, vector<16x128xf32> -> vector<16x128xf32>
    %c0_3 = arith.constant 0 : index
    %c0_4 = arith.constant 0 : index
    %4 = vector.load %arg3[%c0_3, %c0_4] : memref<1x128xf32, #tpu.memory_space<vmem>>, vector<1x128xf32>
    %5 = vector.broadcast %4 : vector<1x128xf32> to vector<16x128xf32>
    %6 = arith.addf %3, %5 : vector<16x128xf32>
    %cst_5 = arith.constant 0.000000e+00 : f32
    %7 = vector.broadcast %cst_5 : f32 to vector<16x128xf32>
    %8 = arith.maximumf %6, %7 : vector<16x128xf32>
    %9 = arith.truncf %8 : vector<16x128xf32> to vector<16x128xbf16>
    %c0_6 = arith.constant 0 : index
    %c0_7 = arith.constant 0 : index
    %10 = vector.load %arg4[%c0_6, %c0_7] : memref<128x128xbf16, #tpu.memory_space<vmem>>, vector<128x128xbf16>
    %cst_8 = arith.constant dense<0.000000e+00> : vector<16x128xf32>
    %11 = tpu.matmul %9, %10, %cst_8 {dimension_numbers = #tpu.dot_dimension_numbers<[1], [0], [0], [1], [0, 0, 1, 1], [], []>} : vector<16x128xbf16>, vector<128x128xbf16>, vector<16x128xf32> -> vector<16x128xf32>
    %c0_9 = arith.constant 0 : index
    %c0_10 = arith.constant 0 : index
    %12 = vector.load %arg5[%c0_9, %c0_10] : memref<1x128xf32, #tpu.memory_space<vmem>>, vector<1x128xf32>
    %13 = vector.broadcast %12 : vector<1x128xf32> to vector<16x128xf32>
    %14 = arith.addf %11, %13 : vector<16x128xf32>
    %cst_11 = arith.constant 0.000000e+00 : f32
    %15 = vector.broadcast %cst_11 : f32 to vector<16x128xf32>
    %16 = arith.maximumf %14, %15 : vector<16x128xf32>
    %17 = arith.truncf %16 : vector<16x128xf32> to vector<16x128xbf16>
    %c0_12 = arith.constant 0 : index
    %c0_13 = arith.constant 0 : index
    %18 = vector.load %arg6[%c0_12, %c0_13] : memref<128x32xbf16, #tpu.memory_space<vmem>>, vector<128x32xbf16>
    %cst_14 = arith.constant dense<0.000000e+00> : vector<16x32xf32>
    %19 = tpu.matmul %17, %18, %cst_14 {dimension_numbers = #tpu.dot_dimension_numbers<[1], [0], [0], [1], [0, 0, 1, 1], [], []>} : vector<16x128xbf16>, vector<128x32xbf16>, vector<16x32xf32> -> vector<16x32xf32>
    %c0_15 = arith.constant 0 : index
    %c0_16 = arith.constant 0 : index
    %20 = vector.load %arg7[%c0_15, %c0_16] : memref<1x32xf32, #tpu.memory_space<vmem>>, vector<1x32xf32>
    %21 = vector.broadcast %20 : vector<1x32xf32> to vector<16x32xf32>
    %22 = arith.addf %19, %21 : vector<16x32xf32>
    %23 = arith.truncf %22 : vector<16x32xf32> to vector<16x32xbf16>
    %c0_17 = arith.constant 0 : index
    %c0_18 = arith.constant 0 : index
    %24 = vector.load %arg8[%c0_17, %c0_18] : memref<16x32xbf16, #tpu.memory_space<vmem>>, vector<16x32xbf16>
    tpu.vector_store %arg8[%c0_17, %c0_18], %23 {strides = array<i32>} : memref<16x32xbf16, #tpu.memory_space<vmem>>, vector<16x32xbf16>,
    return
  }
  func.func @transform_0(%arg0: i32) -> (i32, i32) {
    %c0_i32 = arith.constant 0 : i32
    %c0_i32_0 = arith.constant 0 : i32
    return %arg0, %c0_i32 : i32, i32
  }
  func.func @transform_1(%arg0: i32) -> (i32, i32) {
    %c0_i32 = arith.constant 0 : i32
    %c0_i32_0 = arith.constant 0 : i32
    %c0_i32_1 = arith.constant 0 : i32
    return %c0_i32, %c0_i32_0 : i32, i32
  }
  func.func @transform_2(%arg0: i32) -> (i32, i32) {
    %c0_i32 = arith.constant 0 : i32
    %c0_i32_0 = arith.constant 0 : i32
    %c0_i32_1 = arith.constant 0 : i32
    return %c0_i32, %c0_i32_0 : i32, i32
  }
  func.func @transform_3(%arg0: i32) -> (i32, i32) {
    %c0_i32 = arith.constant 0 : i32
    %c0_i32_0 = arith.constant 0 : i32
    %c0_i32_1 = arith.constant 0 : i32
    return %c0_i32, %c0_i32_0 : i32, i32
  }
  func.func @transform_4(%arg0: i32) -> (i32, i32) {
    %c0_i32 = arith.constant 0 : i32
    %c0_i32_0 = arith.constant 0 : i32
    %c0_i32_1 = arith.constant 0 : i32
    return %c0_i32, %c0_i32_0 : i32, i32
  }
  func.func @transform_5(%arg0: i32) -> (i32, i32) {
    %c0_i32 = arith.constant 0 : i32
    %c0_i32_0 = arith.constant 0 : i32
    %c0_i32_1 = arith.constant 0 : i32
    return %c0_i32, %c0_i32_0 : i32, i32
  }
  func.func @transform_6(%arg0: i32) -> (i32, i32) {
    %c0_i32 = arith.constant 0 : i32
    %c0_i32_0 = arith.constant 0 : i32
    %c0_i32_1 = arith.constant 0 : i32
    return %c0_i32, %c0_i32_0 : i32, i32
  }
  func.func @transform_7(%arg0: i32) -> (i32, i32) {
    %c0_i32 = arith.constant 0 : i32
    %c0_i32_0 = arith.constant 0 : i32
    return %arg0, %c0_i32 : i32, i32
  }
}

</mosaic_0001>

<bundles_post_ra>
// kernel: autoencoder_forward.1
= control target key start
LH: loop header
LB: loop body
LE: loop exit
PB: predicated region body
PF: predicated region fallthrough
CT: control target
= control target key end

     0   :  { %v458_v0 = vmov 0.0   ;;  %vm459_vm0 = vmmov 0   ;;  %vm53_vm1 = vcmask 261120   ;;  %vm336_vm2 = vcmask 257024   ;;  %s599_s1 = inlined_call_operand.vmem [shape: bf16[32,128], index: 1, kind: input, shape index: {}]   ;;  %s600_s0 = inlined_call_operand.vmem [shape: f32[16,32], index: 0, kind: input, shape index: {}]   ;;  %s601_s3 = inlined_call_operand.vmem [shape: bf16[128,128], index: 3, kind: input, shape index: {}]   ;;  %s602_s5 = inlined_call_operand.vmem [shape: bf16[128,32], index: 5, kind: input, shape index: {}]   ;;  %s603_s2 = inlined_call_operand.vmem [shape: f32[1,128], index: 2, kind: input, shape index: {}]   ;;  %s604_s4 = inlined_call_operand.vmem [shape: f32[1,128], index: 4, kind: input, shape index: {}]   ;;  %s605_s6 = inlined_call_operand.vmem [shape: f32[1,32], index: 6, kind: input, shape index: {}]   ;;  %s606_s7 = inlined_call_operand.vmem [shape: bf16[16,32], index: 7, kind: output, shape index: {}]  }
   0x1   :  { %390 = vmatprep.subr.bf16.mxu0 %v458_v0  ;;  %v440_v1 = vld [vmem:[%s599_s1] sm:$0xff]   ;;  %394 = vmatprep.mubr.msk.bf16.mxu0 %vm459_vm0, %v458_v0  ;;  %v441_v2 = vld [vmem:[%s599_s1 + $0x8] sm:$0xff]   ;;  %v444_v8 = vld [vmem:[%s601_s3 + $0x10] sm:$0xff]  }
   0x2   :  { %398 = vmatprep.subr.bf16.mxu1 %v458_v0  ;;  %414 = vmatprep.mubr.msk.bf16.mxu1 %vm459_vm0, %v458_v0  ;;  %v27_v3 = vld [vmem:[%s600_s0] sm:$0xff]  ;;  %v28_v4 = vld [vmem:[%s600_s0 + $0x8] sm:$0xff]  ;;  %v445_v9 = vld [vmem:[%s601_s3 + $0x18] sm:$0xff]  }
   0x3   :  { %391 = vmatpush3.bf16.msra.mxu0 %v440_v1  ;;  %v442_v5 = vld [vmem:[%s601_s3] sm:$0xff]   ;;  %v29_v6 = vpack.c.bf16 %v28_v4, %v27_v3  ;;  %v443_v7 = vld [vmem:[%s601_s3 + $0x8] sm:$0xff]   ;;  %v448_v12 = vld [vmem:[%s601_s3 + $0x30] sm:$0xff]  }
   0x4   :  { %392 = vmatprep.subr.bf16.mxu0 %v458_v0  ;;  %399 = vmatpush3.bf16.msra.mxu1 %v442_v5  ;;  %v446_v10 = vld [vmem:[%s601_s3 + $0x20] sm:$0xff]   ;;  %v447_v11 = vld [vmem:[%s601_s3 + $0x28] sm:$0xff]   ;;  %v449_v13 = vld [vmem:[%s601_s3 + $0x38] sm:$0xff]  }
   0x5   :  { %400 = vmatprep.subr.bf16.mxu1 %v458_v0  ;;  %v450_v14 = vld [vmem:[%s602_s5] sm:$0xff]   ;;  %v451_v15 = vld [vmem:[%s602_s5 + $0x8] sm:$0xff]   ;;  %v452_v16 = vld [vmem:[%s602_s5 + $0x10] sm:$0xff]  }
   0x6   :  { %v453_v17 = vld [vmem:[%s602_s5 + $0x18] sm:$0xff]   ;;  %v454_v18 = vld [vmem:[%s602_s5 + $0x20] sm:$0xff]   ;;  %v455_v19 = vld [vmem:[%s602_s5 + $0x28] sm:$0xff]  }
   0x7   :  { %393 = vmatpush3.bf16.msra.mxu0 %v441_v2  ;;  %v343_v20 = vld [vmem:[%s603_s2] ss:$0 sm:$0xff]  ;;  %v456_v30 = vld [vmem:[%s602_s5 + $0x30] sm:$0xff]   ;;  %v457_v31 = vld [vmem:[%s602_s5 + $0x38] sm:$0xff]  }
   0x8   :  { %418 = vmatprep.subr.bf16.mxu0 %v458_v0  ;;  %401 = vmatpush3.bf16.msra.mxu1 %v443_v7  ;;  %v347_v32 = vld [vmem:[%s604_s4] ss:$0 sm:$0xff] }
   0x9   :  { %402 = vmatprep.subr.bf16.mxu1 %v458_v0  ;;  %v356_v42 = vld [vmem:[%s605_s6] ss:$0 sm:$0xff] }
   0xa   :  { %395 = vmatmul.mubr.msk.bf16.vlgmr.msra.gmra.mrb[0].mxu0 %vm53_vm1, %v29_v6 }
   0xb   :  { %434 = vmatprep.mubr.msk.bf16.mxu0 %vm459_vm0, %v458_v0  ;;  %419 = vmatpush3.bf16.msra.mxu0 %v450_v14 }
   0xc   :  { %403 = vmatpush3.bf16.msra.mxu1 %v444_v8  ;;  %420 = vmatprep.subr.bf16.mxu0 %v458_v0 }
   0xd   :  { %404 = vmatprep.subr.bf16.mxu1 %v458_v0 }
   0xf   :  { %421 = vmatpush3.bf16.msra.mxu0 %v451_v15 }
  0x10   :  { %405 = vmatpush3.bf16.msra.mxu1 %v445_v9  ;;  %422 = vmatprep.subr.bf16.mxu0 %v458_v0 }
  0x11   :  { %406 = vmatprep.subr.bf16.mxu1 %v458_v0 }
  0x13   :  { %423 = vmatpush3.bf16.msra.mxu0 %v452_v16 }
  0x14   :  { %407 = vmatpush3.bf16.msra.mxu1 %v446_v10  ;;  %424 = vmatprep.subr.bf16.mxu0 %v458_v0 }
  0x15   :  { %408 = vmatprep.subr.bf16.mxu1 %v458_v0 }
  0x17   :  { %425 = vmatpush3.bf16.msra.mxu0 %v453_v17 }
  0x18   :  { %409 = vmatpush3.bf16.msra.mxu1 %v447_v11  ;;  %426 = vmatprep.subr.bf16.mxu0 %v458_v0 }
  0x19   :  { %410 = vmatprep.subr.bf16.mxu1 %v458_v0 }
  0x1b   :  { %427 = vmatpush3.bf16.msra.mxu0 %v454_v18 }
  0x1c   :  { %411 = vmatpush3.bf16.msra.mxu1 %v448_v12  ;;  %428 = vmatprep.subr.bf16.mxu0 %v458_v0 }
  0x1d   :  { %412 = vmatprep.subr.bf16.mxu1 %v458_v0 }
  0x1f   :  { %429 = vmatpush3.bf16.msra.mxu0 %v455_v19 }
  0x20   :  { %413 = vmatpush3.bf16.msra.mxu1 %v449_v13  ;;  %430 = vmatprep.subr.bf16.mxu0 %v458_v0 }
  0x23   :  { %431 = vmatpush3.bf16.msra.mxu0 %v456_v30 }
  0x24   :  { %432 = vmatprep.subr.bf16.mxu0 %v458_v0 }
  0x27   :  { %433 = vmatpush3.bf16.msra.mxu0 %v457_v31 }
  0xdd   :  { %v91_v21 = vpop.f32.mrb[0].mxu0 }
  0xde   :  { %v92_v22 = vadd.f32 %v343_v20, %v91_v21  ;;  %v396_v23 = vpop.f32.mrb[1].mxu0 }
  0xdf   :  { %v94_v24 = vpop.f32.mrb[2].mxu0 }
  0xe0   :  { %v95_v25 = vadd.f32 %v343_v20, %v94_v24  ;;  %v397_v26 = vpop.f32.mrb[3].mxu0  ;;  %v98_v27 = vmax.f32 %v92_v22, 0.0 }
  0xe2   :  { %v99_v28 = vmax.f32 %v95_v25, 0.0 }
  0xe4   :  { %v100_v29 = vpack.c.bf16 %v99_v28, %v98_v27 }
  0xe6   :  { %415 = vmatmul.mubr.bf16.vlgmr.msra.gmra.mrb[0].mxu1 %v100_v29 }
 0x1b9   :  { %v206_v33 = vpop.f32.mrb[0].mxu1 }
 0x1ba   :  { %v207_v34 = vadd.f32 %v347_v32, %v206_v33  ;;  %v416_v35 = vpop.f32.mrb[1].mxu1 }
 0x1bb   :  { %v209_v36 = vpop.f32.mrb[2].mxu1 }
 0x1bc   :  { %v210_v37 = vadd.f32 %v347_v32, %v209_v36  ;;  %v417_v38 = vpop.f32.mrb[3].mxu1  ;;  %v213_v39 = vmax.f32 %v207_v34, 0.0 }
 0x1be   :  { %v214_v40 = vmax.f32 %v210_v37, 0.0 }
 0x1c0   :  { %v215_v41 = vpack.c.bf16 %v214_v40, %v213_v39 }
 0x1c2   :  { %435 = vmatmul.mubr.bf16.vlgmr.msra.gmra.mrb[4].mxu0 %v215_v41 }
 0x295   :  { %v321_v43 = vpop.f32.mrb[4].mxu0 }
 0x296   :  { %v322_v44 = vadd.f32 %v356_v42, %v321_v43  ;;  %v436_v45 = vpop.f32.mrb[5].mxu0 }
 0x297   :  { %v324_v46 = vpop.f32.mrb[6].mxu0 }
 0x298   :  { %v367_v47 = vpack.c.bf16 %v322_v44, %v322_v44  ;;  %v325_v48 = vadd.f32 %v356_v42, %v324_v46  ;;  %v437_v49 = vpop.f32.mrb[7].mxu0 }
 0x29a   :  { %337 = vst.msk [vmem:[%s606_s7] sm:$0xf] %vm336_vm2, %v367_v47  ;;  %v368_v50 = vpack.c.bf16 %v325_v48, %v325_v48 }
 0x29c   :  { %338 = vst.msk [vmem:[%s606_s7 + $0x4] sm:$0xf] %vm336_vm2, %v368_v50 }

</bundles_post_ra>
